<compile_context>
chip_gen: v7x
topology: tpu7x:2x2x1
jax: 0.10.0
libtpu: 0.0.40
codegen_flags: <defaults>
</compile_context>

<pallas_src>
import functools

import jax
import jax.numpy as jnp
from jax import lax
from jax.experimental import pallas as pl
from jax.experimental.pallas import tpu as pltpu


def lstm_policy_kernel(x_ref, w_ih_ref, w_hh_ref, b_ref, w_fc_ref, b_fc_ref,
                       logits_ref, *, T, B):
    """LSTM recurrence + output projection, fully VMEM-resident.

    x_ref:      (T*B, I)   time-major flattened inputs (row r = t*B + b)
    w_ih_ref:   (I, 4H)    input->gates weights (PyTorch weight_ih_l0, transposed)
    w_hh_ref:   (H, 4H)    hidden->gates weights (PyTorch weight_hh_l0, transposed)
    b_ref:      (1, 4H)    bias_ih_l0 + bias_hh_l0
    w_fc_ref:   (H, M)     fc.weight transposed
    b_fc_ref:   (1, M)     fc.bias
    logits_ref: (T*B, M)   output logits (time-major flattened)
    """
    H = w_hh_ref.shape[0]

    # Hoisted, loop-invariant weight load (stays in vregs across the loop).
    w_hh = w_hh_ref[...]

    # (1) Batched input projection: one (T*B, I) @ (I, 4H) MXU matmul for every
    #     timestep, off the serial critical path. Bias added once here.
    xg = (jnp.dot(x_ref[...], w_ih_ref[...],
                  preferred_element_type=jnp.float32)
          + b_ref[...])                                            # (T*B, 4H)

    # (2) Serial LSTM recurrence. h/c live in registers (not VMEM scratch);
    #     the T loop is statically unrolled for LLO scheduling visibility.
    h = jnp.zeros((B, H), jnp.float32)
    c = jnp.zeros((B, H), jnp.float32)
    hs = []
    for t in range(T):
        gates = xg[t * B:(t + 1) * B] + jnp.dot(
            h, w_hh, preferred_element_type=jnp.float32)           # (B, 4H)
        # PyTorch gate order: input, forget, cell(g), output.
        sig = jax.nn.sigmoid(gates)              # one full-width EUP op
        i_g = sig[:, 0 * H:1 * H]
        f_g = sig[:, 1 * H:2 * H]
        g_g = jnp.tanh(gates[:, 2 * H:3 * H])    # tanh only on the g slice
        o_g = sig[:, 3 * H:4 * H]
        c = f_g * c + i_g * g_g
        h = o_g * jnp.tanh(c)
        hs.append(h)

    # (3) Batched output projection: one (T*B, H) @ (H, M) matmul + bias and a
    #     single store (no per-step narrow masked stores).
    hs_all = jnp.concatenate(hs, axis=0)                           # (T*B, H)
    logits = (jnp.dot(hs_all, w_fc_ref[...],
                      preferred_element_type=jnp.float32)
              + b_fc_ref[...])                                     # (T*B, M)
    logits_ref[...] = logits.astype(logits_ref.dtype)


@jax.jit
def policy_forward(state, w_ih_t, w_hh_t, b_comb, w_fc_t, b_fc):
    """state: (B, T, I) batch_first float32, like the PyTorch module."""
    B, T, I = state.shape
    H = w_hh_t.shape[0]
    M = w_fc_t.shape[1]

    # Time-major, flattened rows so each timestep is a contiguous slab.
    x_tm = jnp.transpose(state, (1, 0, 2)).reshape(T * B, I)

    vmem = pl.BlockSpec(memory_space=pltpu.MemorySpace.VMEM)
    logits_flat = pl.pallas_call(
        functools.partial(lstm_policy_kernel, T=T, B=B),
        out_shape=jax.ShapeDtypeStruct((T * B, M), jnp.float32),
        in_specs=[vmem] * 6,
        out_specs=vmem,
    )(x_tm, w_ih_t, w_hh_t, b_comb, w_fc_t, b_fc)

    # Back to PyTorch batch_first layout.
    return jnp.transpose(logits_flat.reshape(T, B, M), (1, 0, 2))


def lstm_policy_reference(state, w_ih_t, w_hh_t, b_comb, w_fc_t, b_fc):
    """Pure-JAX reference with identical semantics (for correctness check)."""
    B, T, I = state.shape
    H = w_hh_t.shape[0]

    def step(carry, x_t):
        h, c = carry
        gates = x_t @ w_ih_t + h @ w_hh_t + b_comb[0]
        i = jax.nn.sigmoid(gates[:, 0 * H:1 * H])
        f = jax.nn.sigmoid(gates[:, 1 * H:2 * H])
        g = jnp.tanh(gates[:, 2 * H:3 * H])
        o = jax.nn.sigmoid(gates[:, 3 * H:4 * H])
        c = f * c + i * g
        h = o * jnp.tanh(c)
        return (h, c), h

    init = (jnp.zeros((B, H), jnp.float32), jnp.zeros((B, H), jnp.float32))
    _, hs = lax.scan(step, init, jnp.transpose(state, (1, 0, 2)))
    out = jnp.transpose(hs, (1, 0, 2))                # (B, T, H)
    return out @ w_fc_t + b_fc[0]                     # (B, T, M)


if __name__ == "__main__":
    # Small shapes implied by the module: P=4 -> num_inputs = num_hidden = P*P*2 = 32,
    # M = 8 outputs, K = 2 (batch), seq = 8.
    P, M, K, T = 4, 8, 2, 8
    I = H = P * P * 2

    key = jax.random.PRNGKey(0)
    ks = jax.random.split(key, 8)
    bound = 1.0 / jnp.sqrt(H)  # PyTorch default uniform(-1/sqrt(H), 1/sqrt(H))

    # Parameters (built directly in the transposed layout the kernel uses).
    w_ih_t = jax.random.uniform(ks[0], (I, 4 * H), jnp.float32, -bound, bound)
    w_hh_t = jax.random.uniform(ks[1], (H, 4 * H), jnp.float32, -bound, bound)
    b_ih = jax.random.uniform(ks[2], (4 * H,), jnp.float32, -bound, bound)
    b_hh = jax.random.uniform(ks[3], (4 * H,), jnp.float32, -bound, bound)
    b_comb = (b_ih + b_hh)[None, :]                                   # (1, 4H)
    w_fc_t = jax.random.uniform(ks[4], (H, M), jnp.float32, -bound, bound)
    b_fc = jax.random.uniform(ks[5], (1, M), jnp.float32, -bound, bound)

    # Input state: (batch=K, seq=T, num_inputs=I), batch_first like PyTorch.
    state = jax.random.normal(ks[6], (K, T, I), jnp.float32)

    logits = jax.block_until_ready(
        policy_forward(state, w_ih_t, w_hh_t, b_comb, w_fc_t, b_fc)
    )
    ref = lstm_policy_reference(state, w_ih_t, w_hh_t, b_comb, w_fc_t, b_fc)

    assert logits.shape == (K, T, M), logits.shape
    assert jnp.allclose(logits, ref, atol=1e-5, rtol=1e-5), (
        float(jnp.max(jnp.abs(logits - ref)))
    )
    print("KERNEL_OK")
</pallas_src>

<mosaic_0001>
module attributes {stable_mosaic.version = 11 : i64} {
  func.func @lstm_policy_kernel(%arg0: memref<16x32xf32, #tpu.memory_space<vmem>>, %arg1: memref<32x128xf32, #tpu.memory_space<vmem>>, %arg2: memref<32x128xf32, #tpu.memory_space<vmem>>, %arg3: memref<1x128xf32, #tpu.memory_space<vmem>>, %arg4: memref<32x8xf32, #tpu.memory_space<vmem>>, %arg5: memref<1x8xf32, #tpu.memory_space<vmem>>, %arg6: memref<16x8xf32, #tpu.memory_space<vmem>>) attributes {dimension_semantics = [], scalar_prefetch = 0 : i64, scratch_operands = 0 : i64, tpu.core_type = #tpu.core_type<tc>} {
    %c0 = arith.constant 0 : index
    %c0_0 = arith.constant 0 : index
    %0 = vector.load %arg2[%c0, %c0_0] : memref<32x128xf32, #tpu.memory_space<vmem>>, vector<32x128xf32>
    %c0_1 = arith.constant 0 : index
    %c0_2 = arith.constant 0 : index
    %1 = vector.load %arg0[%c0_1, %c0_2] : memref<16x32xf32, #tpu.memory_space<vmem>>, vector<16x32xf32>
    %c0_3 = arith.constant 0 : index
    %c0_4 = arith.constant 0 : index
    %2 = vector.load %arg1[%c0_3, %c0_4] : memref<32x128xf32, #tpu.memory_space<vmem>>, vector<32x128xf32>
    %cst = arith.constant dense<0.000000e+00> : vector<16x128xf32>
    %3 = tpu.matmul %1, %2, %cst {dimension_numbers = #tpu.dot_dimension_numbers<[1], [0], [0], [1], [0, 0, 1, 1], [], []>} : vector<16x32xf32>, vector<32x128xf32>, vector<16x128xf32> -> vector<16x128xf32>
    %c0_5 = arith.constant 0 : index
    %c0_6 = arith.constant 0 : index
    %4 = vector.load %arg3[%c0_5, %c0_6] : memref<1x128xf32, #tpu.memory_space<vmem>>, vector<1x128xf32>
    %5 = vector.broadcast %4 : vector<1x128xf32> to vector<16x128xf32>
    %6 = arith.addf %3, %5 : vector<16x128xf32>
    %cst_7 = arith.constant 0.000000e+00 : f32
    %7 = vector.broadcast %cst_7 : f32 to vector<2x32xf32>
    %cst_8 = arith.constant 0.000000e+00 : f32
    %8 = vector.broadcast %cst_8 : f32 to vector<2x32xf32>
    %9 = vector.extract_strided_slice %6 {offsets = [0, 0], sizes = [2, 128], strides = [1, 1]} : vector<16x128xf32> to vector<2x128xf32>
    %cst_9 = arith.constant dense<0.000000e+00> : vector<2x128xf32>
    %10 = tpu.matmul %7, %0, %cst_9 {dimension_numbers = #tpu.dot_dimension_numbers<[1], [0], [0], [1], [0, 0, 1, 1], [], []>} : vector<2x32xf32>, vector<32x128xf32>, vector<2x128xf32> -> vector<2x128xf32>
    %11 = arith.addf %9, %10 : vector<2x128xf32>
    %12 = arith.negf %11 : vector<2x128xf32>
    %13 = math.exp %12 : vector<2x128xf32>
    %cst_10 = arith.constant 1.000000e+00 : f32
    %14 = vector.broadcast %cst_10 : f32 to vector<2x128xf32>
    %15 = arith.addf %14, %13 : vector<2x128xf32>
    %16 = arith.divf %14, %15 : vector<2x128xf32>
    %17 = vector.extract_strided_slice %16 {offsets = [0, 0], sizes = [2, 32], strides = [1, 1]} : vector<2x128xf32> to vector<2x32xf32>
    %18 = vector.extract_strided_slice %16 {offsets = [0, 32], sizes = [2, 32], strides = [1, 1]} : vector<2x128xf32> to vector<2x32xf32>
    %19 = vector.extract_strided_slice %11 {offsets = [0, 64], sizes = [2, 32], strides = [1, 1]} : vector<2x128xf32> to vector<2x32xf32>
    %20 = math.tanh %19 : vector<2x32xf32>
    %21 = vector.extract_strided_slice %16 {offsets = [0, 96], sizes = [2, 32], strides = [1, 1]} : vector<2x128xf32> to vector<2x32xf32>
    %22 = arith.mulf %18, %8 : vector<2x32xf32>
    %23 = arith.mulf %17, %20 : vector<2x32xf32>
    %24 = arith.addf %22, %23 : vector<2x32xf32>
    %25 = math.tanh %24 : vector<2x32xf32>
    %26 = arith.mulf %21, %25 : vector<2x32xf32>
    %27 = vector.extract_strided_slice %6 {offsets = [2, 0], sizes = [2, 128], strides = [1, 1]} : vector<16x128xf32> to vector<2x128xf32>
    %cst_11 = arith.constant dense<0.000000e+00> : vector<2x128xf32>
    %28 = tpu.matmul %26, %0, %cst_11 {dimension_numbers = #tpu.dot_dimension_numbers<[1], [0], [0], [1], [0, 0, 1, 1], [], []>} : vector<2x32xf32>, vector<32x128xf32>, vector<2x128xf32> -> vector<2x128xf32>
    %29 = arith.addf %27, %28 : vector<2x128xf32>
    %30 = arith.negf %29 : vector<2x128xf32>
    %31 = math.exp %30 : vector<2x128xf32>
    %cst_12 = arith.constant 1.000000e+00 : f32
    %32 = vector.broadcast %cst_12 : f32 to vector<2x128xf32>
    %33 = arith.addf %32, %31 : vector<2x128xf32>
    %34 = arith.divf %32, %33 : vector<2x128xf32>
    %35 = vector.extract_strided_slice %34 {offsets = [0, 0], sizes = [2, 32], strides = [1, 1]} : vector<2x128xf32> to vector<2x32xf32>
    %36 = vector.extract_strided_slice %34 {offsets = [0, 32], sizes = [2, 32], strides = [1, 1]} : vector<2x128xf32> to vector<2x32xf32>
    %37 = vector.extract_strided_slice %29 {offsets = [0, 64], sizes = [2, 32], strides = [1, 1]} : vector<2x128xf32> to vector<2x32xf32>
    %38 = math.tanh %37 : vector<2x32xf32>
    %39 = vector.extract_strided_slice %34 {offsets = [0, 96], sizes = [2, 32], strides = [1, 1]} : vector<2x128xf32> to vector<2x32xf32>
    %40 = arith.mulf %36, %24 : vector<2x32xf32>
    %41 = arith.mulf %35, %38 : vector<2x32xf32>
    %42 = arith.addf %40, %41 : vector<2x32xf32>
    %43 = math.tanh %42 : vector<2x32xf32>
    %44 = arith.mulf %39, %43 : vector<2x32xf32>
    %45 = vector.extract_strided_slice %6 {offsets = [4, 0], sizes = [2, 128], strides = [1, 1]} : vector<16x128xf32> to vector<2x128xf32>
    %cst_13 = arith.constant dense<0.000000e+00> : vector<2x128xf32>
    %46 = tpu.matmul %44, %0, %cst_13 {dimension_numbers = #tpu.dot_dimension_numbers<[1], [0], [0], [1], [0, 0, 1, 1], [], []>} : vector<2x32xf32>, vector<32x128xf32>, vector<2x128xf32> -> vector<2x128xf32>
    %47 = arith.addf %45, %46 : vector<2x128xf32>
    %48 = arith.negf %47 : vector<2x128xf32>
    %49 = math.exp %48 : vector<2x128xf32>
    %cst_14 = arith.constant 1.000000e+00 : f32
    %50 = vector.broadcast %cst_14 : f32 to vector<2x128xf32>
    %51 = arith.addf %50, %49 : vector<2x128xf32>
    %52 = arith.divf %50, %51 : vector<2x128xf32>
    %53 = vector.extract_strided_slice %52 {offsets = [0, 0], sizes = [2, 32], strides = [1, 1]} : vector<2x128xf32> to vector<2x32xf32>
    %54 = vector.extract_strided_slice %52 {offsets = [0, 32], sizes = [2, 32], strides = [1, 1]} : vector<2x128xf32> to vector<2x32xf32>
    %55 = vector.extract_strided_slice %47 {offsets = [0, 64], sizes = [2, 32], strides = [1, 1]} : vector<2x128xf32> to vector<2x32xf32>
    %56 = math.tanh %55 : vector<2x32xf32>
    %57 = vector.extract_strided_slice %52 {offsets = [0, 96], sizes = [2, 32], strides = [1, 1]} : vector<2x128xf32> to vector<2x32xf32>
    %58 = arith.mulf %54, %42 : vector<2x32xf32>
    %59 = arith.mulf %53, %56 : vector<2x32xf32>
    %60 = arith.addf %58, %59 : vector<2x32xf32>
    %61 = math.tanh %60 : vector<2x32xf32>
    %62 = arith.mulf %57, %61 : vector<2x32xf32>
    %63 = vector.extract_strided_slice %6 {offsets = [6, 0], sizes = [2, 128], strides = [1, 1]} : vector<16x128xf32> to vector<2x128xf32>
    %cst_15 = arith.constant dense<0.000000e+00> : vector<2x128xf32>
    %64 = tpu.matmul %62, %0, %cst_15 {dimension_numbers = #tpu.dot_dimension_numbers<[1], [0], [0], [1], [0, 0, 1, 1], [], []>} : vector<2x32xf32>, vector<32x128xf32>, vector<2x128xf32> -> vector<2x128xf32>
    %65 = arith.addf %63, %64 : vector<2x128xf32>
    %66 = arith.negf %65 : vector<2x128xf32>
    %67 = math.exp %66 : vector<2x128xf32>
    %cst_16 = arith.constant 1.000000e+00 : f32
    %68 = vector.broadcast %cst_16 : f32 to vector<2x128xf32>
    %69 = arith.addf %68, %67 : vector<2x128xf32>
    %70 = arith.divf %68, %69 : vector<2x128xf32>
    %71 = vector.extract_strided_slice %70 {offsets = [0, 0], sizes = [2, 32], strides = [1, 1]} : vector<2x128xf32> to vector<2x32xf32>
    %72 = vector.extract_strided_slice %70 {offsets = [0, 32], sizes = [2, 32], strides = [1, 1]} : vector<2x128xf32> to vector<2x32xf32>
    %73 = vector.extract_strided_slice %65 {offsets = [0, 64], sizes = [2, 32], strides = [1, 1]} : vector<2x128xf32> to vector<2x32xf32>
    %74 = math.tanh %73 : vector<2x32xf32>
    %75 = vector.extract_strided_slice %70 {offsets = [0, 96], sizes = [2, 32], strides = [1, 1]} : vector<2x128xf32> to vector<2x32xf32>
    %76 = arith.mulf %72, %60 : vector<2x32xf32>
    %77 = arith.mulf %71, %74 : vector<2x32xf32>
    %78 = arith.addf %76, %77 : vector<2x32xf32>
    %79 = math.tanh %78 : vector<2x32xf32>
    %80 = arith.mulf %75, %79 : vector<2x32xf32>
    %81 = vector.extract_strided_slice %6 {offsets = [8, 0], sizes = [2, 128], strides = [1, 1]} : vector<16x128xf32> to vector<2x128xf32>
    %cst_17 = arith.constant dense<0.000000e+00> : vector<2x128xf32>
    %82 = tpu.matmul %80, %0, %cst_17 {dimension_numbers = #tpu.dot_dimension_numbers<[1], [0], [0], [1], [0, 0, 1, 1], [], []>} : vector<2x32xf32>, vector<32x128xf32>, vector<2x128xf32> -> vector<2x128xf32>
    %83 = arith.addf %81, %82 : vector<2x128xf32>
    %84 = arith.negf %83 : vector<2x128xf32>
    %85 = math.exp %84 : vector<2x128xf32>
    %cst_18 = arith.constant 1.000000e+00 : f32
    %86 = vector.broadcast %cst_18 : f32 to vector<2x128xf32>
    %87 = arith.addf %86, %85 : vector<2x128xf32>
    %88 = arith.divf %86, %87 : vector<2x128xf32>
    %89 = vector.extract_strided_slice %88 {offsets = [0, 0], sizes = [2, 32], strides = [1, 1]} : vector<2x128xf32> to vector<2x32xf32>
    %90 = vector.extract_strided_slice %88 {offsets = [0, 32], sizes = [2, 32], strides = [1, 1]} : vector<2x128xf32> to vector<2x32xf32>
    %91 = vector.extract_strided_slice %83 {offsets = [0, 64], sizes = [2, 32], strides = [1, 1]} : vector<2x128xf32> to vector<2x32xf32>
    %92 = math.tanh %91 : vector<2x32xf32>
    %93 = vector.extract_strided_slice %88 {offsets = [0, 96], sizes = [2, 32], strides = [1, 1]} : vector<2x128xf32> to vector<2x32xf32>
    %94 = arith.mulf %90, %78 : vector<2x32xf32>
    %95 = arith.mulf %89, %92 : vector<2x32xf32>
    %96 = arith.addf %94, %95 : vector<2x32xf32>
    %97 = math.tanh %96 : vector<2x32xf32>
    %98 = arith.mulf %93, %97 : vector<2x32xf32>
    %99 = vector.extract_strided_slice %6 {offsets = [10, 0], sizes = [2, 128], strides = [1, 1]} : vector<16x128xf32> to vector<2x128xf32>
    %cst_19 = arith.constant dense<0.000000e+00> : vector<2x128xf32>
    %100 = tpu.matmul %98, %0, %cst_19 {dimension_numbers = #tpu.dot_dimension_numbers<[1], [0], [0], [1], [0, 0, 1, 1], [], []>} : vector<2x32xf32>, vector<32x128xf32>, vector<2x128xf32> -> vector<2x128xf32>
    %101 = arith.addf %99, %100 : vector<2x128xf32>
    %102 = arith.negf %101 : vector<2x128xf32>
    %103 = math.exp %102 : vector<2x128xf32>
    %cst_20 = arith.constant 1.000000e+00 : f32
    %104 = vector.broadcast %cst_20 : f32 to vector<2x128xf32>
    %105 = arith.addf %104, %103 : vector<2x128xf32>
    %106 = arith.divf %104, %105 : vector<2x128xf32>
    %107 = vector.extract_strided_slice %106 {offsets = [0, 0], sizes = [2, 32], strides = [1, 1]} : vector<2x128xf32> to vector<2x32xf32>
    %108 = vector.extract_strided_slice %106 {offsets = [0, 32], sizes = [2, 32], strides = [1, 1]} : vector<2x128xf32> to vector<2x32xf32>
    %109 = vector.extract_strided_slice %101 {offsets = [0, 64], sizes = [2, 32], strides = [1, 1]} : vector<2x128xf32> to vector<2x32xf32>
    %110 = math.tanh %109 : vector<2x32xf32>
    %111 = vector.extract_strided_slice %106 {offsets = [0, 96], sizes = [2, 32], strides = [1, 1]} : vector<2x128xf32> to vector<2x32xf32>
    %112 = arith.mulf %108, %96 : vector<2x32xf32>
    %113 = arith.mulf %107, %110 : vector<2x32xf32>
    %114 = arith.addf %112, %113 : vector<2x32xf32>
    %115 = math.tanh %114 : vector<2x32xf32>
    %116 = arith.mulf %111, %115 : vector<2x32xf32>
    %117 = vector.extract_strided_slice %6 {offsets = [12, 0], sizes = [2, 128], strides = [1, 1]} : vector<16x128xf32> to vector<2x128xf32>
    %cst_21 = arith.constant dense<0.000000e+00> : vector<2x128xf32>
    %118 = tpu.matmul %116, %0, %cst_21 {dimension_numbers = #tpu.dot_dimension_numbers<[1], [0], [0], [1], [0, 0, 1, 1], [], []>} : vector<2x32xf32>, vector<32x128xf32>, vector<2x128xf32> -> vector<2x128xf32>
    %119 = arith.addf %117, %118 : vector<2x128xf32>
    %120 = arith.negf %119 : vector<2x128xf32>
    %121 = math.exp %120 : vector<2x128xf32>
    %cst_22 = arith.constant 1.000000e+00 : f32
    %122 = vector.broadcast %cst_22 : f32 to vector<2x128xf32>
    %123 = arith.addf %122, %121 : vector<2x128xf32>
    %124 = arith.divf %122, %123 : vector<2x128xf32>
    %125 = vector.extract_strided_slice %124 {offsets = [0, 0], sizes = [2, 32], strides = [1, 1]} : vector<2x128xf32> to vector<2x32xf32>
    %126 = vector.extract_strided_slice %124 {offsets = [0, 32], sizes = [2, 32], strides = [1, 1]} : vector<2x128xf32> to vector<2x32xf32>
    %127 = vector.extract_strided_slice %119 {offsets = [0, 64], sizes = [2, 32], strides = [1, 1]} : vector<2x128xf32> to vector<2x32xf32>
    %128 = math.tanh %127 : vector<2x32xf32>
    %129 = vector.extract_strided_slice %124 {offsets = [0, 96], sizes = [2, 32], strides = [1, 1]} : vector<2x128xf32> to vector<2x32xf32>
    %130 = arith.mulf %126, %114 : vector<2x32xf32>
    %131 = arith.mulf %125, %128 : vector<2x32xf32>
    %132 = arith.addf %130, %131 : vector<2x32xf32>
    %133 = math.tanh %132 : vector<2x32xf32>
    %134 = arith.mulf %129, %133 : vector<2x32xf32>
    %135 = vector.extract_strided_slice %6 {offsets = [14, 0], sizes = [2, 128], strides = [1, 1]} : vector<16x128xf32> to vector<2x128xf32>
    %cst_23 = arith.constant dense<0.000000e+00> : vector<2x128xf32>
    %136 = tpu.matmul %134, %0, %cst_23 {dimension_numbers = #tpu.dot_dimension_numbers<[1], [0], [0], [1], [0, 0, 1, 1], [], []>} : vector<2x32xf32>, vector<32x128xf32>, vector<2x128xf32> -> vector<2x128xf32>
    %137 = arith.addf %135, %136 : vector<2x128xf32>
    %138 = arith.negf %137 : vector<2x128xf32>
    %139 = math.exp %138 : vector<2x128xf32>
    %cst_24 = arith.constant 1.000000e+00 : f32
    %140 = vector.broadcast %cst_24 : f32 to vector<2x128xf32>
    %141 = arith.addf %140, %139 : vector<2x128xf32>
    %142 = arith.divf %140, %141 : vector<2x128xf32>
    %143 = vector.extract_strided_slice %142 {offsets = [0, 0], sizes = [2, 32], strides = [1, 1]} : vector<2x128xf32> to vector<2x32xf32>
    %144 = vector.extract_strided_slice %142 {offsets = [0, 32], sizes = [2, 32], strides = [1, 1]} : vector<2x128xf32> to vector<2x32xf32>
    %145 = vector.extract_strided_slice %137 {offsets = [0, 64], sizes = [2, 32], strides = [1, 1]} : vector<2x128xf32> to vector<2x32xf32>
    %146 = math.tanh %145 : vector<2x32xf32>
    %147 = vector.extract_strided_slice %142 {offsets = [0, 96], sizes = [2, 32], strides = [1, 1]} : vector<2x128xf32> to vector<2x32xf32>
    %148 = arith.mulf %144, %132 : vector<2x32xf32>
    %149 = arith.mulf %143, %146 : vector<2x32xf32>
    %150 = arith.addf %148, %149 : vector<2x32xf32>
    %151 = math.tanh %150 : vector<2x32xf32>
    %152 = arith.mulf %147, %151 : vector<2x32xf32>
    %153 = tpu.concatenate %26, %44, %62, %80, %98, %116, %134, %152 in 0 : vector<2x32xf32>, vector<2x32xf32>, vector<2x32xf32>, vector<2x32xf32>, vector<2x32xf32>, vector<2x32xf32>, vector<2x32xf32>, vector<2x32xf32> -> vector<16x32xf32>
    %c0_25 = arith.constant 0 : index
    %c0_26 = arith.constant 0 : index
    %154 = vector.load %arg4[%c0_25, %c0_26] : memref<32x8xf32, #tpu.memory_space<vmem>>, vector<32x8xf32>
    %cst_27 = arith.constant dense<0.000000e+00> : vector<16x8xf32>
    %155 = tpu.matmul %153, %154, %cst_27 {dimension_numbers = #tpu.dot_dimension_numbers<[1], [0], [0], [1], [0, 0, 1, 1], [], []>} : vector<16x32xf32>, vector<32x8xf32>, vector<16x8xf32> -> vector<16x8xf32>
    %c0_28 = arith.constant 0 : index
    %c0_29 = arith.constant 0 : index
    %156 = vector.load %arg5[%c0_28, %c0_29] : memref<1x8xf32, #tpu.memory_space<vmem>>, vector<1x8xf32>
    %157 = vector.broadcast %156 : vector<1x8xf32> to vector<16x8xf32>
    %158 = arith.addf %155, %157 : vector<16x8xf32>
    %c0_30 = arith.constant 0 : index
    %c0_31 = arith.constant 0 : index
    %159 = vector.load %arg6[%c0_30, %c0_31] : memref<16x8xf32, #tpu.memory_space<vmem>>, vector<16x8xf32>
    tpu.vector_store %arg6[%c0_30, %c0_31], %158 {strides = array<i32>} : memref<16x8xf32, #tpu.memory_space<vmem>>, vector<16x8xf32>,
    return
  }
}

</mosaic_0001>

<bundles_post_ra>
// kernel: policy_forward.1
= control target key start
LH: loop header
LB: loop body
LE: loop exit
PB: predicated region body
PF: predicated region fallthrough
CT: control target
= control target key end

     0   :  { %v1392_v2 = vmov 0.0|0.0   ;;  %vm40_vm0 = vcmask 261120   ;;  %vm1393_vm1 = vmmov 0   ;;  %v1394_v4 = vmov 0.0   ;;  %s1395_s16 = smov 64   ;;  %s1612_s1 = inlined_call_operand.vmem [shape: f32[32,128], index: 1, kind: input, shape index: {}]   ;;  %s1613_s2 = inlined_call_operand.vmem [shape: f32[32,128], index: 2, kind: input, shape index: {}]   ;;  %s1614_s0 = inlined_call_operand.vmem [shape: f32[16,32], index: 0, kind: input, shape index: {}]   ;;  %s1615_s3 = inlined_call_operand.vmem [shape: f32[1,128], index: 3, kind: input, shape index: {}]   ;;  %s1616_s4 = inlined_call_operand.vmem [shape: f32[32,8], index: 4, kind: input, shape index: {}]   ;;  %s1617_s5 = inlined_call_operand.vmem [shape: f32[1,8], index: 5, kind: input, shape index: {}]   ;;  %s1618_s6 = inlined_call_operand.vmem [shape: f32[16,8], index: 6, kind: output, shape index: {}]  }
   0x1   :  { %v29_v0 = vld [vmem:[%s1612_s1] sm:$0xff]  ;;  %v30_v1 = vld [vmem:[%s1612_s1 + $0x8] sm:$0xff]  ;;  %1267 = vmatprep.subr.bf16.mxu1 %v1392_v2  ;;  %1168 = vmatprep.mubr.msk.f32.mxu1 %vm1393_vm1, %v1394_v4  ;;  %v31_v7 = vld [vmem:[%s1612_s1 + $0x10] sm:$0xff]  ;;  %vm964_vm2 = vcmask 1041408   ;;  %vm966_vm3 = vcmask 1043456   ;;  %vm968_vm4 = vcmask 1045504  }
   0x2   :  { %v23_v3 = vld [vmem:[%s1613_s2] sm:$0xff]  ;;  %v1259_v5 = vpack.c.bf16 %v30_v1, %v29_v0  ;;  %v24_v6 = vld [vmem:[%s1613_s2 + $0x8] sm:$0xff]  ;;  %v32_v8 = vld [vmem:[%s1612_s1 + $0x18] sm:$0xff]  ;;  %vm1069_vm5 = vcmask 64512  }
   0x3   :  { %v1453_v9 = vpack.c.bf16 %v24_v6, %v23_v3  ;;  %v1263_v10 = vpack.c.bf16 %v32_v8, %v31_v7  ;;  %v27_v11 = vld [vmem:[%s1614_s0] sm:$0xff]  ;;  %v25_v12 = vld [vmem:[%s1613_s2 + $0x10] sm:$0xff]  ;;  %v26_v13 = vld [vmem:[%s1613_s2 + $0x18] sm:$0xff] }
   0x4   :  { %1260 = vmatprep.subr.bf16.mxu0 %v1259_v5  ;;  %1157 = vmatprep.mubr.msk.f32.mxu0 %vm40_vm0, %v27_v11  ;;  %v1466_v14 = vpack.c.bf16 %v26_v13, %v25_v12  ;;  %v28_v15 = vld [vmem:[%s1614_s0 + $0x8] sm:$0xff]  ;;  %v1076_v16 = vld [vmem:[%s1615_s3] ss:$0 sm:$0xff]  ;;  %s1396_s3 = smov 32  }
   0x5   :  { %1262 = vmatpush3.bf16.msra.mxu0 %v1259_v5  ;;  %1269 = vmatpush3.bf16.msra.mxu1 %v1453_v9 }
   0x6   :  { %1264 = vmatprep.subr.bf16.mxu0 %v1263_v10  ;;  %1270 = vmatprep.subr.bf16.mxu1 %v1392_v2 }
   0x9   :  { %1266 = vmatpush3.bf16.msra.mxu0 %v1263_v10  ;;  %1272 = vmatpush3.bf16.msra.mxu1 %v1466_v14 }
   0xa   :  { %1273 = vmatprep.subr.bf16.mxu0 %v1392_v2  ;;  %1279 = vmatprep.subr.bf16.mxu1 %v1392_v2 }
   0xc   :  { %1158 = vmatmul.mubr.msk.f32.vlgmr.msra.gmra.mrb[0].mxu0 %vm40_vm0, %v28_v15  ;;  %1169 = vmatmul.mubr.f32.vlgmr.msra.gmra.mrb[0].mxu1 %v1394_v4 }
   0xd   :  { %1275 = vmatpush3.bf16.msra.mxu0 %v1453_v9  ;;  %1179 = vmatprep.mubr.msk.f32.mxu0 %vm1393_vm1, %v1394_v4 }
   0xe   :  { %1276 = vmatprep.subr.bf16.mxu0 %v1392_v2  ;;  %1281 = vmatpush3.bf16.msra.mxu1 %v1453_v9 }
   0xf   :  { %1282 = vmatprep.subr.bf16.mxu1 %v1392_v2  ;;  %1190 = vmatprep.mubr.msk.f32.mxu1 %vm1393_vm1, %v1394_v4 }
  0x11   :  { %1278 = vmatpush3.bf16.msra.mxu0 %v1466_v14 }
  0x12   :  { %1284 = vmatpush3.bf16.msra.mxu1 %v1466_v14  ;;  %1285 = vmatprep.subr.bf16.mxu0 %v1392_v2 }
  0x13   :  { %1291 = vmatprep.subr.bf16.mxu1 %v1392_v2 }
  0xdf   :  { %v1159_v17 = vpop.f32.mrb[0].mxu0  ;;  %v191_v18 = vpop.f32.mrb[0].mxu1 }
  0xe0   :  { %v1492_v19 = vadd.f32 %v1159_v17, %v1076_v16  ;;  %v113_v20 = vpop.f32.mrb[1].mxu0  ;;  %v1170_v21 = vpop.f32.mrb[1].mxu1 }
  0xe1   :  { %v1494_v22 = vadd.f32 %v1076_v16, %v113_v20 }
  0xe3   :  { %v195_v23 = vadd.f32 %v191_v18, %v1494_v22 }
  0xe5   :  { %1328 = vtanh.f32 %v195_v23  ;;  %v1079_v25 = vmul.f32 -1.442695, %v195_v23 }
  0xe7   :  { %1330 = vpow2.f32 %v1079_v25 }
  0xef   :  { %v1329_v24 = vpop.eup %1328 }
  0xf0   :  { %205 = vrot.lane.b32.xlu0 %v1329_v24, %s1395_s16 }
  0xf1   :  { %v1331_v26 = vpop.eup %1330 }
  0xf2   :  { %v199_v27 = vadd.f32 1.0, %v1331_v26 }
  0xf4   :  { %1332 = vrcp.f32 %v199_v27 }
  0xfe   :  { %v1333_v28 = vpop.eup %1332 }
  0xff   :  { %v203_v31 = vmul.f32 0.0, %v1333_v28 }
 0x162   :  { %v206_v29 = vpop.permute.xlu0 %205 }
 0x163   :  { %v208_v30 = vmul.f32 %v1333_v28, %v206_v29 }
 0x165   :  { %210 = vrot.lane.b32.xlu0 %v208_v30, %s1396_s3 }
 0x1d7   :  { %v211_v32 = vpop.permute.xlu0 %210 }
 0x1d8   :  { %v213_v33 = vadd.f32 %v211_v32, %v203_v31 }
 0x1da   :  { %1334 = vtanh.f32 %v213_v33  ;;  %v307_v49 = vrot.slane %v213_v33, 6 }
 0x1e4   :  { %v1335_v34 = vpop.eup %1334 }
 0x1e5   :  { %216 = vrot.lane.b32.xlu1 %v1335_v34, %s1395_s16 }
 0x257   :  { %v217_v35 = vpop.permute.xlu1 %216 }
 0x258   :  { %v1500_v36 = vmul.f32 %v1333_v28, %v217_v35 }
 0x25a   :  { %221 = vrot.lane.b32.xlu1 %v1500_v36, %s1396_s3 }
 0x2cc   :  { %v222_v37 = vpop.permute.xlu1 %221 }
 0x2cd   :  { %1180 = vmatmul.mubr.msk.f32.vlgmr.msra.gmra.mrb[2].mxu0 %vm40_vm0, %v222_v37 }
 0x2ce   :  { %1287 = vmatpush3.bf16.msra.mxu0 %v1453_v9  ;;  %1201 = vmatprep.mubr.msk.f32.mxu0 %vm1393_vm1, %v1394_v4 }
 0x2cf   :  { %1288 = vmatprep.subr.bf16.mxu0 %v1392_v2 }
 0x2d2   :  { %1290 = vmatpush3.bf16.msra.mxu0 %v1466_v14 }
 0x2d3   :  { %1297 = vmatprep.subr.bf16.mxu0 %v1392_v2 }
 0x3a0   :  { %v291_v38 = vpop.f32.mrb[2].mxu0 }
 0x3a1   :  { %v296_v39 = vrot.slane %v291_v38, 6  ;;  %v1181_v40 = vpop.f32.mrb[3].mxu0 }
 0x3a3   :  { %v298_v41 = vadd.f32 %v296_v39, %v1494_v22 }
 0x3a5   :  { %1336 = vtanh.f32 %v298_v41  ;;  %v1081_v43 = vmul.f32 -1.442695, %v298_v41 }
 0x3a7   :  { %1338 = vpow2.f32 %v1081_v43 }
 0x3af   :  { %v1337_v42 = vpop.eup %1336 }
 0x3b0   :  { %311 = vrot.lane.b32.xlu0 %v1337_v42, %s1395_s16 }
 0x3b1   :  { %v1339_v44 = vpop.eup %1338 }
 0x3b2   :  { %v302_v45 = vadd.f32 1.0, %v1339_v44 }
 0x3b4   :  { %1340 = vrcp.f32 %v302_v45 }
 0x3be   :  { %v1341_v46 = vpop.eup %1340 }
 0x3bf   :  { %v309_v50 = vmul.f32 %v1341_v46, %v307_v49 }
 0x422   :  { %v312_v47 = vpop.permute.xlu0 %311 }
 0x423   :  { %v314_v48 = vmul.f32 %v1341_v46, %v312_v47 }
 0x425   :  { %316 = vrot.lane.b32.xlu1 %v314_v48, %s1396_s3 }
 0x497   :  { %v317_v51 = vpop.permute.xlu1 %316 }
 0x498   :  { %v319_v52 = vadd.f32 %v317_v51, %v309_v50 }
 0x49a   :  { %1342 = vtanh.f32 %v319_v52  ;;  %v414_v7 = vrot.slane %v319_v52, 6 }
 0x4a4   :  { %v1343_v53 = vpop.eup %1342 }
 0x4a5   :  { %322 = vrot.lane.b32.xlu0 %v1343_v53, %s1395_s16 }
 0x517   :  { %v323_v54 = vpop.permute.xlu0 %322 }
 0x518   :  { %v325_v55 = vmul.f32 %v1341_v46, %v323_v54 }
 0x51a   :  { %v327_v56 = vrot.slane %v325_v55, 2  ;;  %v965_v16 = vsel %vm964_vm2, %v1500_v36, %v325_v55 }
 0x51c   :  { %328 = vrot.lane.b32.xlu1 %v327_v56, %s1396_s3 }
 0x58e   :  { %v329_v57 = vpop.permute.xlu1 %328 }
 0x58f   :  { %1191 = vmatmul.mubr.msk.f32.vlgmr.msra.gmra.mrb[2].mxu1 %vm40_vm0, %v329_v57 }
 0x590   :  { %1293 = vmatpush3.bf16.msra.mxu1 %v1453_v9  ;;  %1212 = vmatprep.mubr.msk.f32.mxu1 %vm1393_vm1, %v1394_v4 }
 0x591   :  { %1294 = vmatprep.subr.bf16.mxu1 %v1392_v2 }
 0x594   :  { %1296 = vmatpush3.bf16.msra.mxu1 %v1466_v14 }
 0x595   :  { %1303 = vmatprep.subr.bf16.mxu1 %v1392_v2 }
 0x662   :  { %v398_v58 = vpop.f32.mrb[2].mxu1 }
 0x663   :  { %v403_v59 = vrot.slane %v398_v58, 4  ;;  %v1192_v60 = vpop.f32.mrb[3].mxu1 }
 0x665   :  { %v405_v61 = vadd.f32 %v403_v59, %v1494_v22 }
 0x667   :  { %1344 = vtanh.f32 %v405_v61  ;;  %v1083_v63 = vmul.f32 -1.442695, %v405_v61 }
 0x669   :  { %1346 = vpow2.f32 %v1083_v63 }
 0x671   :  { %v1345_v62 = vpop.eup %1344 }
 0x672   :  { %418 = vrot.lane.b32.xlu0 %v1345_v62, %s1395_s16 }
 0x673   :  { %v1347_v0 = vpop.eup %1346 }
 0x674   :  { %v409_v1 = vadd.f32 1.0, %v1347_v0 }
 0x676   :  { %1348 = vrcp.f32 %v409_v1 }
 0x680   :  { %v1349_v3 = vpop.eup %1348 }
 0x681   :  { %v416_v8 = vmul.f32 %v1349_v3, %v414_v7 }
 0x6e4   :  { %v419_v5 = vpop.permute.xlu0 %418 }
 0x6e5   :  { %v421_v6 = vmul.f32 %v1349_v3, %v419_v5 }
 0x6e7   :  { %423 = vrot.lane.b32.xlu1 %v421_v6, %s1396_s3 }
 0x759   :  { %v424_v10 = vpop.permute.xlu1 %423 }
 0x75a   :  { %v426_v11 = vadd.f32 %v424_v10, %v416_v8 }
 0x75c   :  { %1350 = vtanh.f32 %v426_v11  ;;  %v521_v33 = vrot.slane %v426_v11, 6 }
 0x766   :  { %v1351_v12 = vpop.eup %1350 }
 0x767   :  { %429 = vrot.lane.b32.xlu0 %v1351_v12, %s1395_s16 }
 0x7d9   :  { %v430_v13 = vpop.permute.xlu0 %429 }
 0x7da   :  { %v432_v15 = vmul.f32 %v1349_v3, %v430_v13 }
 0x7dc   :  { %v434_v17 = vrot.slane %v432_v15, 4  ;;  %v967_v18 = vsel %vm966_vm3, %v965_v16, %v432_v15 }
 0x7de   :  { %435 = vrot.lane.b32.xlu1 %v434_v17, %s1396_s3 }
 0x850   :  { %v436_v20 = vpop.permute.xlu1 %435 }
 0x851   :  { %1202 = vmatmul.mubr.msk.f32.vlgmr.msra.gmra.mrb[4].mxu0 %vm40_vm0, %v436_v20 }
 0x852   :  { %1299 = vmatpush3.bf16.msra.mxu0 %v1453_v9  ;;  %1223 = vmatprep.mubr.msk.f32.mxu0 %vm1393_vm1, %v1394_v4 }
 0x853   :  { %1300 = vmatprep.subr.bf16.mxu0 %v1392_v2 }
 0x856   :  { %1302 = vmatpush3.bf16.msra.mxu0 %v1466_v14 }
 0x857   :  { %1309 = vmatprep.subr.bf16.mxu0 %v1392_v2 }
 0x924   :  { %v505_v21 = vpop.f32.mrb[4].mxu0 }
 0x925   :  { %v510_v23 = vrot.slane %v505_v21, 2  ;;  %v1203_v24 = vpop.f32.mrb[5].mxu0 }
 0x927   :  { %v512_v25 = vadd.f32 %v510_v23, %v1494_v22 }
 0x929   :  { %1352 = vtanh.f32 %v512_v25  ;;  %v1085_v27 = vmul.f32 -1.442695, %v512_v25 }
 0x92b   :  { %1354 = vpow2.f32 %v1085_v27 }
 0x933   :  { %v1353_v26 = vpop.eup %1352 }
 0x934   :  { %525 = vrot.lane.b32.xlu0 %v1353_v26, %s1395_s16 }
 0x935   :  { %v1355_v28 = vpop.eup %1354 }
 0x936   :  { %v516_v29 = vadd.f32 1.0, %v1355_v28 }
 0x938   :  { %1356 = vrcp.f32 %v516_v29 }
 0x942   :  { %v1357_v30 = vpop.eup %1356 }
 0x943   :  { %v523_v34 = vmul.f32 %v1357_v30, %v521_v33 }
 0x9a6   :  { %v526_v31 = vpop.permute.xlu0 %525 }
 0x9a7   :  { %v528_v32 = vmul.f32 %v1357_v30, %v526_v31 }
 0x9a9   :  { %530 = vrot.lane.b32.xlu1 %v528_v32, %s1396_s3 }
 0xa1b   :  { %v531_v35 = vpop.permute.xlu1 %530 }
 0xa1c   :  { %v533_v36 = vadd.f32 %v531_v35, %v523_v34 }
 0xa1e   :  { %1358 = vtanh.f32 %v533_v36  ;;  %v625_v52 = vrot.slane %v533_v36, 6 }
 0xa28   :  { %v1359_v22 = vpop.eup %1358 }
 0xa29   :  { %536 = vrot.lane.b32.xlu0 %v1359_v22, %s1395_s16 }
 0xa9b   :  { %v537_v37 = vpop.permute.xlu0 %536 }
 0xa9c   :  { %v539_v38 = vmul.f32 %v1357_v30, %v537_v37 }
 0xa9e   :  { %v541_v39 = vrot.slane %v539_v38, 6  ;;  %v1543_v40 = vsel %vm968_vm4, %v967_v18, %v539_v38 }
 0xaa0   :  { %542 = vrot.lane.b32.xlu1 %v541_v39, %s1396_s3 }
 0xb12   :  { %v543_v41 = vpop.permute.xlu1 %542 }
 0xb13   :  { %1213 = vmatmul.mubr.msk.f32.vlgmr.msra.gmra.mrb[4].mxu1 %vm40_vm0, %v543_v41 }
 0xb14   :  { %1305 = vmatpush3.bf16.msra.mxu1 %v1453_v9  ;;  %1234 = vmatprep.mubr.msk.f32.mxu1 %vm1393_vm1, %v1394_v4 }
 0xb15   :  { %1306 = vmatprep.subr.bf16.mxu1 %v1392_v2 }
 0xb18   :  { %1308 = vmatpush3.bf16.msra.mxu1 %v1466_v14 }
 0xbe6   :  { %v612_v42 = vpop.f32.mrb[4].mxu1 }
 0xbe7   :  { %v616_v43 = vadd.f32 %v612_v42, %v1492_v19  ;;  %v1214_v44 = vpop.f32.mrb[5].mxu1 }
 0xbe9   :  { %1360 = vtanh.f32 %v616_v43  ;;  %v1087_v46 = vmul.f32 -1.442695, %v616_v43 }
 0xbeb   :  { %1362 = vpow2.f32 %v1087_v46 }
 0xbf3   :  { %v1361_v45 = vpop.eup %1360 }
 0xbf4   :  { %629 = vrot.lane.b32.xlu0 %v1361_v45, %s1395_s16 }
 0xbf5   :  { %v1363_v47 = vpop.eup %1362 }
 0xbf6   :  { %v620_v48 = vadd.f32 1.0, %v1363_v47 }
 0xbf8   :  { %1364 = vrcp.f32 %v620_v48 }
 0xc02   :  { %v1365_v49 = vpop.eup %1364 }
 0xc03   :  { %v627_v53 = vmul.f32 %v1365_v49, %v625_v52 }
 0xc66   :  { %v630_v50 = vpop.permute.xlu0 %629 }
 0xc67   :  { %v632_v51 = vmul.f32 %v1365_v49, %v630_v50 }
 0xc69   :  { %634 = vrot.lane.b32.xlu1 %v632_v51, %s1396_s3 }
 0xcdb   :  { %v635_v54 = vpop.permute.xlu1 %634 }
 0xcdc   :  { %v637_v55 = vadd.f32 %v635_v54, %v627_v53 }
 0xcde   :  { %1366 = vtanh.f32 %v637_v55 }
 0xce8   :  { %v1367_v56 = vpop.eup %1366 }
 0xce9   :  { %640 = vrot.lane.b32.xlu0 %v1367_v56, %s1395_s16  ;;  %v974_v56 = vld [vmem:[%s1616_s4 + $0x8] sm:$0xff] }
 0xd5b   :  { %v641_v57 = vpop.permute.xlu0 %640 }
 0xd5c   :  { %v1556_v58 = vmul.f32 %v1365_v49, %v641_v57 }
 0xd5e   :  { %645 = vrot.lane.b32.xlu1 %v1556_v58, %s1396_s3 }
 0xdd0   :  { %v646_v59 = vpop.permute.xlu1 %645 }
 0xdd1   :  { %1224 = vmatmul.mubr.msk.f32.vlgmr.msra.gmra.mrb[6].mxu0 %vm40_vm0, %v646_v59 }
 0xdd2   :  { %1311 = vmatpush3.bf16.msra.mxu0 %v1453_v9  ;;  %1245 = vmatprep.mubr.msk.f32.mxu0 %vm1393_vm1, %v1394_v4 }
 0xdd3   :  { %1312 = vmatprep.subr.bf16.mxu0 %v1392_v2  ;;  %v731_v2 = vrot.slane %v637_v55, 6  ;;  %v973_v55 = vld [vmem:[%s1616_s4] sm:$0xff] }
 0xdd4   :  { %v1315_v57 = vpack.c.bf16 %v974_v56, %v973_v55 }
 0xdd6   :  { %1314 = vmatpush3.bf16.msra.mxu0 %v1466_v14  ;;  %1316 = vmatprep.subr.bf16.mxu1 %v1315_v57 }
 0xea4   :  { %v715_v60 = vpop.f32.mrb[6].mxu0 }
 0xea5   :  { %v720_v61 = vrot.slane %v715_v60, 6  ;;  %v1225_v62 = vpop.f32.mrb[7].mxu0 }
 0xea7   :  { %v722_v63 = vadd.f32 %v720_v61, %v1492_v19 }
 0xea9   :  { %1368 = vtanh.f32 %v722_v63  ;;  %v1089_v1 = vmul.f32 -1.442695, %v722_v63 }
 0xeab   :  { %1370 = vpow2.f32 %v1089_v1  ;;  %v1094_v1 = vld [vmem:[%s1617_s5] ss:$0 sm:$0xff] }
 0xeb3   :  { %v1369_v0 = vpop.eup %1368 }
 0xeb4   :  { %735 = vrot.lane.b32.xlu0 %v1369_v0, %s1395_s16 }
 0xeb5   :  { %v1371_v3 = vpop.eup %1370 }
 0xeb6   :  { %v726_v9 = vadd.f32 1.0, %v1371_v3 }
 0xeb8   :  { %1372 = vrcp.f32 %v726_v9 }
 0xec2   :  { %v1373_v5 = vpop.eup %1372 }
 0xec3   :  { %v733_v14 = vmul.f32 %v1373_v5, %v731_v2 }
 0xf26   :  { %v736_v4 = vpop.permute.xlu0 %735 }
 0xf27   :  { %v738_v6 = vmul.f32 %v1373_v5, %v736_v4 }
 0xf29   :  { %740 = vrot.lane.b32.xlu1 %v738_v6, %s1396_s3 }
 0xf9b   :  { %v741_v7 = vpop.permute.xlu1 %740 }
 0xf9c   :  { %v743_v8 = vadd.f32 %v741_v7, %v733_v14 }
 0xf9e   :  { %1374 = vtanh.f32 %v743_v8  ;;  %v838_v29 = vrot.slane %v743_v8, 6 }
 0xfa8   :  { %v1375_v10 = vpop.eup %1374 }
 0xfa9   :  { %746 = vrot.lane.b32.xlu0 %v1375_v10, %s1395_s16 }
0x101b   :  { %v747_v11 = vpop.permute.xlu0 %746 }
0x101c   :  { %v749_v12 = vmul.f32 %v1373_v5, %v747_v11 }
0x101e   :  { %v751_v13 = vrot.slane %v749_v12, 2  ;;  %v970_v36 = vsel %vm964_vm2, %v1556_v58, %v749_v12  ;;  %v976_v58 = vld [vmem:[%s1616_s4 + $0x18] sm:$0xff] }
0x1020   :  { %752 = vrot.lane.b32.xlu1 %v751_v13, %s1396_s3 }
0x1092   :  { %v753_v15 = vpop.permute.xlu1 %752 }
0x1093   :  { %1235 = vmatmul.mubr.msk.f32.vlgmr.msra.gmra.mrb[6].mxu1 %vm40_vm0, %v753_v15 }
0x1094   :  { %1318 = vmatpush3.bf16.msra.mxu1 %v1315_v57 }
0x1166   :  { %v822_v16 = vpop.f32.mrb[6].mxu1 }
0x1167   :  { %v827_v17 = vrot.slane %v822_v16, 4  ;;  %v1236_v18 = vpop.f32.mrb[7].mxu1 }
0x1169   :  { %v829_v20 = vadd.f32 %v827_v17, %v1492_v19 }
0x116b   :  { %1376 = vtanh.f32 %v829_v20  ;;  %v1091_v23 = vmul.f32 -1.442695, %v829_v20 }
0x116d   :  { %1378 = vpow2.f32 %v1091_v23 }
0x1175   :  { %v1377_v21 = vpop.eup %1376 }
0x1176   :  { %842 = vrot.lane.b32.xlu0 %v1377_v21, %s1395_s16 }
0x1177   :  { %v1379_v24 = vpop.eup %1378 }
0x1178   :  { %v833_v25 = vadd.f32 1.0, %v1379_v24 }
0x117a   :  { %1380 = vrcp.f32 %v833_v25 }
0x1184   :  { %v1381_v26 = vpop.eup %1380 }
0x1185   :  { %v840_v30 = vmul.f32 %v1381_v26, %v838_v29 }
0x11e8   :  { %v843_v27 = vpop.permute.xlu0 %842 }
0x11e9   :  { %v845_v28 = vmul.f32 %v1381_v26, %v843_v27 }
0x11eb   :  { %847 = vrot.lane.b32.xlu1 %v845_v28, %s1396_s3 }
0x125d   :  { %v848_v31 = vpop.permute.xlu1 %847 }
0x125e   :  { %v850_v32 = vadd.f32 %v848_v31, %v840_v30 }
0x1260   :  { %1382 = vtanh.f32 %v850_v32  ;;  %v945_v51 = vrot.slane %v850_v32, 6 }
0x126a   :  { %v1383_v33 = vpop.eup %1382 }
0x126b   :  { %853 = vrot.lane.b32.xlu0 %v1383_v33, %s1395_s16 }
0x12dd   :  { %v854_v34 = vpop.permute.xlu0 %853 }
0x12de   :  { %v856_v35 = vmul.f32 %v1381_v26, %v854_v34 }
0x12e0   :  { %v858_v22 = vrot.slane %v856_v35, 4  ;;  %v971_v37 = vsel %vm966_vm3, %v970_v36, %v856_v35 }
0x12e2   :  { %859 = vrot.lane.b32.xlu1 %v858_v22, %s1396_s3 }
0x1354   :  { %v860_v38 = vpop.permute.xlu1 %859 }
0x1355   :  { %1246 = vmatmul.mubr.msk.f32.vlgmr.msra.gmra.mrb[8].mxu0 %vm40_vm0, %v860_v38 }
0x1428   :  { %v929_v39 = vpop.f32.mrb[8].mxu0 }
0x1429   :  { %v934_v41 = vrot.slane %v929_v39, 2  ;;  %v1247_v42 = vpop.f32.mrb[9].mxu0 }
0x142b   :  { %v936_v43 = vadd.f32 %v934_v41, %v1492_v19 }
0x142d   :  { %1384 = vtanh.f32 %v936_v43  ;;  %v1093_v45 = vmul.f32 -1.442695, %v936_v43 }
0x142f   :  { %1386 = vpow2.f32 %v1093_v45 }
0x1437   :  { %v1385_v44 = vpop.eup %1384 }
0x1438   :  { %949 = vrot.lane.b32.xlu0 %v1385_v44, %s1395_s16 }
0x1439   :  { %v1387_v46 = vpop.eup %1386 }
0x143a   :  { %v940_v47 = vadd.f32 1.0, %v1387_v46 }
0x143c   :  { %1388 = vrcp.f32 %v940_v47 }
0x1446   :  { %v1389_v48 = vpop.eup %1388 }
0x1447   :  { %v947_v52 = vmul.f32 %v1389_v48, %v945_v51 }
0x14aa   :  { %v950_v49 = vpop.permute.xlu0 %949 }
0x14ab   :  { %v952_v50 = vmul.f32 %v1389_v48, %v950_v49 }
0x14ad   :  { %954 = vrot.lane.b32.xlu1 %v952_v50, %s1396_s3 }
0x14b1   :  { %986 = vrot.lane.b32.xlu1 %v1543_v40, %s1396_s3  ;;  %v975_v40 = vld [vmem:[%s1616_s4 + $0x10] sm:$0xff] }
0x14b2   :  { %v1319_v59 = vpack.c.bf16 %v976_v58, %v975_v40 }
0x14b4   :  { %1320 = vmatprep.subr.bf16.mxu1 %v1319_v59 }
0x14b5   :  { %1322 = vmatpush3.bf16.msra.mxu1 %v1319_v59 }
0x151f   :  { %v955_v19 = vpop.permute.xlu1 %954 }
0x1520   :  { %v957_v53 = vadd.f32 %v955_v19, %v947_v52 }
0x1522   :  { %1390 = vtanh.f32 %v957_v53 }
0x1523   :  { %v987_v54 = vpop.permute.xlu1 %986 }
0x1524   :  { %1256 = vmatprep.mubr.msk.f32.mxu1 %vm40_vm0, %v987_v54 }
0x152c   :  { %v1391_v60 = vpop.eup %1390 }
0x152d   :  { %960 = vrot.lane.b32.xlu0 %v1391_v60, %s1395_s16 }
0x159f   :  { %v961_v61 = vpop.permute.xlu0 %960 }
0x15a0   :  { %v963_v62 = vmul.f32 %v1389_v48, %v961_v61 }
0x15a2   :  { %v972_v63 = vsel %vm968_vm4, %v971_v37, %v963_v62 }
0x15a3   :  { %988 = vrot.lane.b32.xlu0 %v972_v63, %s1396_s3 }
0x1615   :  { %v989_v0 = vpop.permute.xlu0 %988 }
0x1616   :  { %1257 = vmatmul.mubr.msk.f32.vlgmr.msra.gmra.mrb[8].mxu1 %vm40_vm0, %v989_v0 }
0x16e9   :  { %v1258_v3 = vpop.f32.mrb[8].mxu1 }
0x16ea   :  { %v1066_v9 = vadd.f32 %v1258_v3, %v1094_v1  ;;  %v1060_v5 = vpop.f32.mrb[9].mxu1 }
0x16eb   :  { %v1061_v4 = vadd.f32 %v1094_v1, %v1060_v5 }
0x16ec   :  { %1071 = vst.msk [vmem:[%s1618_s6 + $0x8] sm:$0xff] %vm1069_vm5, %v1066_v9 }
0x16ed   :  { %1070 = vst.msk [vmem:[%s1618_s6] sm:$0xff] %vm1069_vm5, %v1061_v4 }

</bundles_post_ra>
